<compile_context>
chip_gen: v7x
topology: tpu7x:2x2x1
jax: 0.10.0
libtpu: 0.0.40
codegen_flags: <defaults>
</compile_context>

<pallas_src>
import math
import functools

import jax
import jax.numpy as jnp
from jax.experimental import pallas as pl
from jax.experimental.pallas import tpu as pltpu


NEG_INF = -1e30  # finite "-inf": exp underflows to 0, so fully-masked rows stay
                 # finite (the torch reference yields NaN there -- intentional).


def _flash_mha_kernel(q_ref, kt_ref, v_ref, mask_ref, wo_ref, bo_ref, out_ref,
                      m_sc, l_sc, o_sc, acc_sc,
                      *, masked, wo_resident):
    """One grid step = (batch b, q-block qi, head h, k-block ki).

    q_ref   : (1, 1, TQ, dh)  pre-projected, pre-scaled Q for head h
    kt_ref  : (1, 1, dh, TK)  pre-projected K, already transposed
    v_ref   : (1, 1, TK, dh)  pre-projected V
    mask_ref: (1, TQ, TK) or (1, 1, TK) int8 (nonzero == masked), or (1,1,1) dummy
    wo_ref  : (H, dh, D) if wo_resident else (1, dh, D)
    """
    h = pl.program_id(2)
    ki = pl.program_id(3)
    num_h = pl.num_programs(2)
    num_k = pl.num_programs(3)

    # ---- new (b, qi, h): reset online-softmax state -------------------------
    @pl.when(ki == 0)
    def _init():
        m_sc[...] = jnp.full_like(m_sc, NEG_INF)
        l_sc[...] = jnp.zeros_like(l_sc)
        o_sc[...] = jnp.zeros_like(o_sc)

    q = q_ref[0, 0]        # (TQ, dh), model dtype, scale already folded in
    k_t = kt_ref[0, 0]     # (dh, TK), model dtype
    v = v_ref[0, 0]        # (TK, dh), model dtype

    # ---- scores: plain lane-dense matmul, f32 accumulation -------------------
    s = jnp.dot(q, k_t, preferred_element_type=jnp.float32)        # (TQ, TK)
    if masked:  # static; covers user mask and/or padded key columns
        s = jnp.where(mask_ref[0] != 0, NEG_INF, s)

    # ---- online softmax update ------------------------------------------------
    m_prev = m_sc[...]
    m_new = jnp.maximum(m_prev, jnp.max(s, axis=-1, keepdims=True))
    alpha = jnp.exp(m_prev - m_new)
    p = jnp.exp(s - m_new)                                          # (TQ, TK) f32
    l_sc[...] = alpha * l_sc[...] + jnp.sum(p, axis=-1, keepdims=True)
    o_sc[...] = alpha * o_sc[...] + jnp.dot(p.astype(v.dtype), v,
                                            preferred_element_type=jnp.float32)
    m_sc[...] = m_new

    # ---- last k-block of this head: normalize (folded 1/l), project through
    #      this head's rows of Wo, and accumulate across heads -----------------
    @pl.when(ki == num_k - 1)
    def _finalize_head():
        o_h = o_sc[...] * pl.reciprocal(l_sc[...], approx=True)     # (TQ, dh)
        w_o = wo_ref[h] if wo_resident else wo_ref[0]               # (dh, D)
        partial = jnp.dot(o_h.astype(w_o.dtype), w_o,
                          preferred_element_type=jnp.float32)       # (TQ, D)

        @pl.when(h == 0)
        def _():
            acc_sc[...] = partial

        @pl.when(h > 0)
        def _():
            acc_sc[...] = acc_sc[...] + partial

        @pl.when(h == num_h - 1)
        def _():
            out_ref[0] = (acc_sc[...] + bo_ref[...].astype(jnp.float32)
                          ).astype(out_ref.dtype)


def _vmem_capacity_bytes():
    try:
        info = pltpu.get_tpu_info()
        cap = getattr(info, "vmem_capacity_bytes", None)
        if cap:
            return int(cap)
    except Exception:
        pass
    return 64 * 1024 * 1024      # conservative fallback (v7x per-TensorCore VMEM)


def _pick_block(dim, want, quantum):
    """Largest legal block <= want (multiple of quantum), or the full dim."""
    if dim <= want:
        return dim
    b = (want // quantum) * quantum
    if b == 0:
        b = quantum
    return min(b, dim)


def multi_head_attention(query, key=None, value=None, mask=None, *,
                         params, num_heads, block_q=None, block_k=None):
    """query: (B, Sq, D); key/value: (B, Sk, D) or None (self-attention);
       mask: (B or 1, Sq, Sk), nonzero/True where masked, or None.
       Matches MultiHeadAttention.forward with dropout == atten_dropout == 0."""
    if key is None and value is None:                 # self-attention
        key = query
        value = query
    B, Sq, D = query.shape
    Sk = key.shape[1]
    assert D % num_heads == 0
    dh = D // num_heads
    wq, bq, wk, bk, wv, bv, wo, bo = params

    # ---- generation-aware VMEM budget and block defaults ----------------------
    vmem_cap = _vmem_capacity_bytes()
    vmem_limit = max(32 << 20, min(100 << 20, (vmem_cap * 3) // 4))
    if block_q is None:
        block_q = 256
    if block_k is None:                               # bigger k-blocks on 128 MiB chips
        block_k = 1024 if vmem_cap >= (100 << 20) else 512

    apply_mask = mask is not None
    itemsize = jnp.dtype(query.dtype).itemsize
    act_quantum = {4: 8, 2: 16, 1: 32}.get(itemsize, 8)
    tq = _pick_block(Sq, block_q, 32 if apply_mask else act_quantum)
    tk = _pick_block(Sk, block_k, 128)                # lane-dense score tiles
    nq = pl.cdiv(Sq, tq)
    nk = pl.cdiv(Sk, tk)
    sk_pad = nk * tk

    # ---- Q/K/V projections: one big GEMM each, OUTSIDE the kernel -------------
    scale = 1.0 / math.sqrt(dh)
    q = (query @ wq + bq) * scale                     # fold 1/sqrt(dh) into Q once
    k = key @ wk + bk
    v = value @ wv + bv
    q_h = q.reshape(B, Sq, num_heads, dh).transpose(0, 2, 1, 3)    # (B, H, Sq, dh)
    k_t = k.reshape(B, Sk, num_heads, dh).transpose(0, 2, 3, 1)    # (B, H, dh, Sk)
    v_h = v.reshape(B, Sk, num_heads, dh).transpose(0, 2, 1, 3)    # (B, H, Sk, dh)
    if sk_pad > Sk:                                   # explicit zero pad: no stale data
        k_t = jnp.pad(k_t, ((0, 0), (0, 0), (0, 0), (0, sk_pad - Sk)))
        v_h = jnp.pad(v_h, ((0, 0), (0, 0), (0, sk_pad - Sk), (0, 0)))

    # ---- mask handling ---------------------------------------------------------
    if apply_mask:
        mask_i8 = mask.astype(jnp.int8)               # 4x less DMA than f32
        if sk_pad > Sk:                               # padded key columns are masked
            mask_i8 = jnp.pad(mask_i8, ((0, 0), (0, 0), (0, sk_pad - Sk)),
                              constant_values=1)
        if mask.shape[0] == 1 and B > 1:              # batch-broadcast mask
            mask_spec = pl.BlockSpec((1, tq, tk), lambda b, qi, h, ki: (0, qi, ki))
        else:
            mask_spec = pl.BlockSpec((1, tq, tk), lambda b, qi, h, ki: (b, qi, ki))
        masked = True
    elif sk_pad > Sk:
        # No user mask but the last k-block has padded key columns: ship a tiny
        # (1, 1, sk_pad) row mask, broadcast over the q rows in-kernel.
        mask_i8 = (jnp.arange(sk_pad) >= Sk).astype(jnp.int8).reshape(1, 1, sk_pad)
        mask_spec = pl.BlockSpec((1, 1, tk), lambda b, qi, h, ki: (0, 0, ki))
        masked = True
    else:
        mask_i8 = jnp.zeros((1, 1, 1), jnp.int8)      # dummy, never read
        mask_spec = pl.BlockSpec((1, 1, 1), lambda b, qi, h, ki: (0, 0, 0))
        masked = False

    # ---- Wo: fully VMEM-resident if it fits comfortably -----------------------
    wo_hd = wo.reshape(num_heads, dh, D)              # head-major rows of Wo
    bo2 = bo.reshape(1, D)
    wo_bytes = D * D * jnp.dtype(wo.dtype).itemsize
    wo_resident = wo_bytes <= vmem_limit // 4         # leave room for double-buffering
    if wo_resident:
        wo_spec = pl.BlockSpec((num_heads, dh, D), lambda b, qi, h, ki: (0, 0, 0))
    else:
        wo_spec = pl.BlockSpec((1, dh, D), lambda b, qi, h, ki: (h, 0, 0))

    kernel = functools.partial(_flash_mha_kernel, masked=masked,
                               wo_resident=wo_resident)

    in_specs = [
        pl.BlockSpec((1, 1, tq, dh), lambda b, qi, h, ki: (b, h, qi, 0)),   # Q
        pl.BlockSpec((1, 1, dh, tk), lambda b, qi, h, ki: (b, h, 0, ki)),   # K^T
        pl.BlockSpec((1, 1, tk, dh), lambda b, qi, h, ki: (b, h, ki, 0)),   # V
        mask_spec,
        wo_spec,
        pl.BlockSpec((1, D), lambda b, qi, h, ki: (0, 0)),                  # out bias
    ]
    out_spec = pl.BlockSpec((1, tq, D), lambda b, qi, h, ki: (b, qi, 0))

    scratch = [
        pltpu.VMEM((tq, 1), jnp.float32),    # m: running row max
        pltpu.VMEM((tq, 1), jnp.float32),    # l: running row sum
        pltpu.VMEM((tq, dh), jnp.float32),   # o: running (unnormalized) P@V
        pltpu.VMEM((tq, D), jnp.float32),    # cross-head output accumulator
    ]

    return pl.pallas_call(
        kernel,
        out_shape=jax.ShapeDtypeStruct((B, Sq, D), query.dtype),
        grid_spec=pltpu.PrefetchScalarGridSpec(
            num_scalar_prefetch=0,
            grid=(B, nq, num_heads, nk),          # reduction axes (h, ki) innermost
            in_specs=in_specs,
            out_specs=out_spec,
            scratch_shapes=scratch,
        ),
        compiler_params=pltpu.CompilerParams(
            dimension_semantics=("parallel", "parallel", "arbitrary", "arbitrary"),
            vmem_limit_bytes=int(vmem_limit),
        ),
    )(q_h, k_t, v_h, mask_i8, wo_hd, bo2)


def _reference(query, key, value, mask, params, *, num_heads):
    """Plain-JAX reference mirroring the PyTorch forward (dropout p=0)."""
    if key is None and value is None:
        key = query
        value = query
    wq, bq, wk, bk, wv, bv, wo, bo = params
    B, Sq, D = query.shape
    Sk = key.shape[1]
    dh = D // num_heads
    q = query @ wq + bq
    k = key @ wk + bk
    v = value @ wv + bv
    q = q.reshape(B, Sq, num_heads, dh).transpose(0, 2, 1, 3)
    k = k.reshape(B, Sk, num_heads, dh).transpose(0, 2, 1, 3)
    v = v.reshape(B, Sk, num_heads, dh).transpose(0, 2, 1, 3)
    scores = jnp.einsum("bhqd,bhkd->bhqk", q, k) / math.sqrt(dh)
    if mask is not None:
        scores = jnp.where(mask[:, None, :, :], -jnp.inf, scores)
    attn = jax.nn.softmax(scores, axis=-1)
    o = jnp.einsum("bhqk,bhkd->bhqd", attn, v)
    o = o.transpose(0, 2, 1, 3).reshape(B, Sq, D)
    return o @ wo + bo


if __name__ == "__main__":
    B, H, D = 2, 4, 128
    Sq_self = 64                   # 2 q-blocks at block_q=32 (mask -> 32-row quantum)
    Sq_cross, Sk_cross = 16, 320   # 3 k-blocks at block_k=128 (key dim pads to 384)

    root = jax.random.PRNGKey(0)
    ks = jax.random.split(root, 12)

    # nn.Linear-style init, weights stored pre-transposed as [d_in, d_out].
    w_scale = 1.0 / math.sqrt(D)
    wq = jax.random.uniform(ks[0], (D, D), jnp.float32, -w_scale, w_scale)
    bq = jax.random.uniform(ks[1], (D,), jnp.float32, -w_scale, w_scale)
    wk = jax.random.uniform(ks[2], (D, D), jnp.float32, -w_scale, w_scale)
    bk = jax.random.uniform(ks[3], (D,), jnp.float32, -w_scale, w_scale)
    wv = jax.random.uniform(ks[4], (D, D), jnp.float32, -w_scale, w_scale)
    bv = jax.random.uniform(ks[5], (D,), jnp.float32, -w_scale, w_scale)
    wo = jax.random.uniform(ks[6], (D, D), jnp.float32, -w_scale, w_scale)
    bo = jax.random.uniform(ks[7], (D,), jnp.float32, -w_scale, w_scale)
    params = (wq, bq, wk, bk, wv, bv, wo, bo)

    # ---- Test 1: causal self-attention (bool mask, True == masked) ------------
    # Exercises q-block tiling, the int8 mask path and cross-head accumulation.
    x = jax.random.normal(ks[8], (B, Sq_self, D), jnp.float32)
    causal = jnp.arange(Sq_self)[None, :] > jnp.arange(Sq_self)[:, None]
    mask = jnp.broadcast_to(causal, (B, Sq_self, Sq_self))

    out1 = multi_head_attention(x, None, None, mask, params=params,
                                num_heads=H, block_q=32, block_k=512)
    out1 = jax.block_until_ready(out1)
    ref1 = _reference(x, None, None, mask, params, num_heads=H)
    assert out1.shape == (B, Sq_self, D)
    assert jnp.allclose(out1, ref1, atol=5e-3, rtol=5e-3), "self-attention mismatch"

    # ---- Test 2: cross-attention, no mask, several k-blocks + padded keys -----
    # Exercises the online-softmax accumulation over k blocks and key padding.
    xq = jax.random.normal(ks[9], (B, Sq_cross, D), jnp.float32)
    enc = jax.random.normal(ks[10], (B, Sk_cross, D), jnp.float32)
    out2 = multi_head_attention(xq, enc, enc, None, params=params,
                                num_heads=H, block_q=256, block_k=128)
    out2 = jax.block_until_ready(out2)
    ref2 = _reference(xq, enc, enc, None, params, num_heads=H)
    assert out2.shape == (B, Sq_cross, D)
    assert jnp.allclose(out2, ref2, atol=5e-3, rtol=5e-3), "cross-attention mismatch"

    # TODO(synk): attention_scores stashing (store_attention_scores -> numpy on host)
    # and dropout / atten_dropout with p > 0 are not represented (identity at p=0).
    print("KERNEL_OK")
</pallas_src>

<mosaic_0001>
module attributes {stable_mosaic.version = 11 : i64} {
  func.func @_flash_mha_kernel(%arg0: i32, %arg1: i32, %arg2: i32, %arg3: i32, %arg4: memref<1x1x32x32xf32, #tpu.memory_space<vmem>>, %arg5: memref<1x1x32x64xf32, #tpu.memory_space<vmem>>, %arg6: memref<1x1x64x32xf32, #tpu.memory_space<vmem>>, %arg7: memref<1x32x64xi8, #tpu.memory_space<vmem>>, %arg8: memref<4x32x128xf32, #tpu.memory_space<vmem>>, %arg9: memref<1x128xf32, #tpu.memory_space<vmem>>, %arg10: memref<1x32x128xf32, #tpu.memory_space<vmem>>, %arg11: memref<32x1xf32, #tpu.memory_space<vmem>>, %arg12: memref<32x1xf32, #tpu.memory_space<vmem>>, %arg13: memref<32x32xf32, #tpu.memory_space<vmem>>, %arg14: memref<32x128xf32, #tpu.memory_space<vmem>>) attributes {dimension_semantics = [#tpu.dimension_semantics<parallel>, #tpu.dimension_semantics<parallel>, #tpu.dimension_semantics<arbitrary>, #tpu.dimension_semantics<arbitrary>], iteration_bounds = array<i64: 2, 2, 4, 1>, scalar_prefetch = 0 : i64, scratch_operands = 4 : i64, tpu.core_type = #tpu.core_type<tc>, window_params = [{transform_indices = @transform_0, window_bounds = array<i64: 1, 1, 32, 32>}, {transform_indices = @transform_1, window_bounds = array<i64: 1, 1, 32, 64>}, {transform_indices = @transform_2, window_bounds = array<i64: 1, 1, 64, 32>}, {transform_indices = @transform_3, window_bounds = array<i64: 1, 32, 64>}, {pipeline_mode = #tpu.pipeline_mode<synchronous>, transform_indices = @transform_4, window_bounds = array<i64: 4, 32, 128>}, {pipeline_mode = #tpu.pipeline_mode<synchronous>, transform_indices = @transform_5, window_bounds = array<i64: 1, 128>}, {transform_indices = @transform_6, window_bounds = array<i64: 1, 32, 128>}]} {
    %c0_i32 = arith.constant 0 : i32
    %0 = arith.cmpi eq, %arg3, %c0_i32 : i32
    %1 = arith.extui %0 : i1 to i32
    %c0_i32_0 = arith.constant 0 : i32
    %2 = arith.cmpi ne, %1, %c0_i32_0 : i32
    scf.if %2 {
      %cst_33 = arith.constant -1.000000e+30 : f32
      %41 = vector.broadcast %cst_33 : f32 to vector<32x1xf32>
      %c0_34 = arith.constant 0 : index
      %c0_35 = arith.constant 0 : index
      %42 = vector.load %arg11[%c0_34, %c0_35] : memref<32x1xf32, #tpu.memory_space<vmem>>, vector<32x1xf32>
      tpu.vector_store %arg11[%c0_34, %c0_35], %41 {strides = array<i32>} : memref<32x1xf32, #tpu.memory_space<vmem>>, vector<32x1xf32>,
      %cst_36 = arith.constant 0.000000e+00 : f32
      %43 = vector.broadcast %cst_36 : f32 to vector<32x1xf32>
      %c0_37 = arith.constant 0 : index
      %c0_38 = arith.constant 0 : index
      %44 = vector.load %arg12[%c0_37, %c0_38] : memref<32x1xf32, #tpu.memory_space<vmem>>, vector<32x1xf32>
      tpu.vector_store %arg12[%c0_37, %c0_38], %43 {strides = array<i32>} : memref<32x1xf32, #tpu.memory_space<vmem>>, vector<32x1xf32>,
      %cst_39 = arith.constant 0.000000e+00 : f32
      %45 = vector.broadcast %cst_39 : f32 to vector<32x32xf32>
      %c0_40 = arith.constant 0 : index
      %c0_41 = arith.constant 0 : index
      %46 = vector.load %arg13[%c0_40, %c0_41] : memref<32x32xf32, #tpu.memory_space<vmem>>, vector<32x32xf32>
      tpu.vector_store %arg13[%c0_40, %c0_41], %45 {strides = array<i32>} : memref<32x32xf32, #tpu.memory_space<vmem>>, vector<32x32xf32>,
    } else {
    }
    %c0 = arith.constant 0 : index
    %c0_1 = arith.constant 0 : index
    %c0_2 = arith.constant 0 : index
    %c0_3 = arith.constant 0 : index
    %3 = vector.load %arg4[%c0, %c0_1, %c0_2, %c0_3] : memref<1x1x32x32xf32, #tpu.memory_space<vmem>>, vector<1x1x32x32xf32>
    %4 = vector.shape_cast %3 : vector<1x1x32x32xf32> to vector<32x32xf32>
    %c0_4 = arith.constant 0 : index
    %c0_5 = arith.constant 0 : index
    %c0_6 = arith.constant 0 : index
    %c0_7 = arith.constant 0 : index
    %5 = vector.load %arg5[%c0_4, %c0_5, %c0_6, %c0_7] : memref<1x1x32x64xf32, #tpu.memory_space<vmem>>, vector<1x1x32x64xf32>
    %6 = vector.shape_cast %5 : vector<1x1x32x64xf32> to vector<32x64xf32>
    %c0_8 = arith.constant 0 : index
    %c0_9 = arith.constant 0 : index
    %c0_10 = arith.constant 0 : index
    %c0_11 = arith.constant 0 : index
    %7 = vector.load %arg6[%c0_8, %c0_9, %c0_10, %c0_11] : memref<1x1x64x32xf32, #tpu.memory_space<vmem>>, vector<1x1x64x32xf32>
    %8 = vector.shape_cast %7 : vector<1x1x64x32xf32> to vector<64x32xf32>
    %cst = arith.constant dense<0.000000e+00> : vector<32x64xf32>
    %9 = tpu.matmul %4, %6, %cst {dimension_numbers = #tpu.dot_dimension_numbers<[1], [0], [0], [1], [0, 0, 1, 1], [], []>} : vector<32x32xf32>, vector<32x64xf32>, vector<32x64xf32> -> vector<32x64xf32>
    %c0_12 = arith.constant 0 : index
    %c0_13 = arith.constant 0 : index
    %c0_14 = arith.constant 0 : index
    %10 = vector.load %arg7[%c0_12, %c0_13, %c0_14] : memref<1x32x64xi8, #tpu.memory_space<vmem>>, vector<1x32x64xi8>
    %11 = vector.shape_cast %10 : vector<1x32x64xi8> to vector<32x64xi8>
    %c0_i8 = arith.constant 0 : i8
    %12 = vector.broadcast %c0_i8 : i8 to vector<32x64xi8>
    %13 = arith.cmpi ne, %11, %12 : vector<32x64xi8>
    %cst_15 = arith.constant -1.000000e+30 : f32
    %14 = vector.broadcast %cst_15 : f32 to vector<32x64xf32>
    %15 = arith.select %13, %14, %9 : vector<32x64xi1>, vector<32x64xf32>
    %c0_16 = arith.constant 0 : index
    %c0_17 = arith.constant 0 : index
    %16 = vector.load %arg11[%c0_16, %c0_17] : memref<32x1xf32, #tpu.memory_space<vmem>>, vector<32x1xf32>
    %cst_18 = arith.constant dense<0xFF800000> : vector<32xf32>
    %17 = vector.multi_reduction <maximumf>, %15, %cst_18 [1] : vector<32x64xf32> to vector<32xf32>
    %18 = vector.shape_cast %17 : vector<32xf32> to vector<32x1xf32>
    %19 = arith.maximumf %16, %18 : vector<32x1xf32>
    %20 = arith.subf %16, %19 : vector<32x1xf32>
    %21 = math.exp %20 : vector<32x1xf32>
    %22 = vector.broadcast %19 : vector<32x1xf32> to vector<32x64xf32>
    %23 = arith.subf %15, %22 : vector<32x64xf32>
    %24 = math.exp %23 : vector<32x64xf32>
    %c0_19 = arith.constant 0 : index
    %c0_20 = arith.constant 0 : index
    %25 = vector.load %arg12[%c0_19, %c0_20] : memref<32x1xf32, #tpu.memory_space<vmem>>, vector<32x1xf32>
    %26 = arith.mulf %21, %25 : vector<32x1xf32>
    %cst_21 = arith.constant dense<0.000000e+00> : vector<32xf32>
    %27 = vector.multi_reduction <add>, %24, %cst_21 [1] : vector<32x64xf32> to vector<32xf32>
    %28 = vector.shape_cast %27 : vector<32xf32> to vector<32x1xf32>
    %29 = arith.addf %26, %28 : vector<32x1xf32>
    %c0_22 = arith.constant 0 : index
    %c0_23 = arith.constant 0 : index
    %30 = vector.load %arg12[%c0_22, %c0_23] : memref<32x1xf32, #tpu.memory_space<vmem>>, vector<32x1xf32>
    tpu.vector_store %arg12[%c0_22, %c0_23], %29 {strides = array<i32>} : memref<32x1xf32, #tpu.memory_space<vmem>>, vector<32x1xf32>,
    %c0_24 = arith.constant 0 : index
    %c0_25 = arith.constant 0 : index
    %31 = vector.load %arg13[%c0_24, %c0_25] : memref<32x32xf32, #tpu.memory_space<vmem>>, vector<32x32xf32>
    %32 = vector.broadcast %21 : vector<32x1xf32> to vector<32x32xf32>
    %33 = arith.mulf %32, %31 : vector<32x32xf32>
    %cst_26 = arith.constant dense<0.000000e+00> : vector<32x32xf32>
    %34 = tpu.matmul %24, %8, %cst_26 {dimension_numbers = #tpu.dot_dimension_numbers<[1], [0], [0], [1], [0, 0, 1, 1], [], []>} : vector<32x64xf32>, vector<64x32xf32>, vector<32x32xf32> -> vector<32x32xf32>
    %35 = arith.addf %33, %34 : vector<32x32xf32>
    %c0_27 = arith.constant 0 : index
    %c0_28 = arith.constant 0 : index
    %36 = vector.load %arg13[%c0_27, %c0_28] : memref<32x32xf32, #tpu.memory_space<vmem>>, vector<32x32xf32>
    tpu.vector_store %arg13[%c0_27, %c0_28], %35 {strides = array<i32>} : memref<32x32xf32, #tpu.memory_space<vmem>>, vector<32x32xf32>,
    %c0_29 = arith.constant 0 : index
    %c0_30 = arith.constant 0 : index
    %37 = vector.load %arg11[%c0_29, %c0_30] : memref<32x1xf32, #tpu.memory_space<vmem>>, vector<32x1xf32>
    tpu.vector_store %arg11[%c0_29, %c0_30], %19 {strides = array<i32>} : memref<32x1xf32, #tpu.memory_space<vmem>>, vector<32x1xf32>,
    %c0_i32_31 = arith.constant 0 : i32
    %38 = arith.cmpi eq, %arg3, %c0_i32_31 : i32
    %39 = arith.extui %38 : i1 to i32
    %c0_i32_32 = arith.constant 0 : i32
    %40 = arith.cmpi ne, %39, %c0_i32_32 : i32
    scf.if %40 {
      %c0_33 = arith.constant 0 : index
      %c0_34 = arith.constant 0 : index
      %41 = vector.load %arg13[%c0_33, %c0_34] : memref<32x32xf32, #tpu.memory_space<vmem>>, vector<32x32xf32>
      %c0_35 = arith.constant 0 : index
      %c0_36 = arith.constant 0 : index
      %42 = vector.load %arg12[%c0_35, %c0_36] : memref<32x1xf32, #tpu.memory_space<vmem>>, vector<32x1xf32>
      %43 = tpu.reciprocal %42 {approx = true} : vector<32x1xf32> -> vector<32x1xf32>
      %44 = vector.broadcast %43 : vector<32x1xf32> to vector<32x32xf32>
      %45 = arith.mulf %41, %44 : vector<32x32xf32>
      %46 = arith.index_cast %arg2 : i32 to index
      %c0_37 = arith.constant 0 : index
      %c0_38 = arith.constant 0 : index
      %47 = vector.load %arg8[%46, %c0_37, %c0_38] : memref<4x32x128xf32, #tpu.memory_space<vmem>>, vector<1x32x128xf32>
      %48 = vector.shape_cast %47 : vector<1x32x128xf32> to vector<32x128xf32>
      %cst_39 = arith.constant dense<0.000000e+00> : vector<32x128xf32>
      %49 = tpu.matmul %45, %48, %cst_39 {dimension_numbers = #tpu.dot_dimension_numbers<[1], [0], [0], [1], [0, 0, 1, 1], [], []>} : vector<32x32xf32>, vector<32x128xf32>, vector<32x128xf32> -> vector<32x128xf32>
      %c0_i32_40 = arith.constant 0 : i32
      %50 = arith.cmpi eq, %arg2, %c0_i32_40 : i32
      %51 = arith.extui %50 : i1 to i32
      %c0_i32_41 = arith.constant 0 : i32
      %52 = arith.cmpi ne, %51, %c0_i32_41 : i32
      scf.if %52 {
        %c0_45 = arith.constant 0 : index
        %c0_46 = arith.constant 0 : index
        %59 = vector.load %arg14[%c0_45, %c0_46] : memref<32x128xf32, #tpu.memory_space<vmem>>, vector<32x128xf32>
        tpu.vector_store %arg14[%c0_45, %c0_46], %49 {strides = array<i32>} : memref<32x128xf32, #tpu.memory_space<vmem>>, vector<32x128xf32>,
      } else {
      }
      %c0_i32_42 = arith.constant 0 : i32
      %53 = arith.cmpi sgt, %arg2, %c0_i32_42 : i32
      %54 = arith.extui %53 : i1 to i32
      %c0_i32_43 = arith.constant 0 : i32
      %55 = arith.cmpi ne, %54, %c0_i32_43 : i32
      scf.if %55 {
        %c0_45 = arith.constant 0 : index
        %c0_46 = arith.constant 0 : index
        %59 = vector.load %arg14[%c0_45, %c0_46] : memref<32x128xf32, #tpu.memory_space<vmem>>, vector<32x128xf32>
        %60 = arith.addf %59, %49 : vector<32x128xf32>
        %c0_47 = arith.constant 0 : index
        %c0_48 = arith.constant 0 : index
        %61 = vector.load %arg14[%c0_47, %c0_48] : memref<32x128xf32, #tpu.memory_space<vmem>>, vector<32x128xf32>
        tpu.vector_store %arg14[%c0_47, %c0_48], %60 {strides = array<i32>} : memref<32x128xf32, #tpu.memory_space<vmem>>, vector<32x128xf32>,
      } else {
      }
      %c3_i32 = arith.constant 3 : i32
      %56 = arith.cmpi eq, %arg2, %c3_i32 : i32
      %57 = arith.extui %56 : i1 to i32
      %c0_i32_44 = arith.constant 0 : i32
      %58 = arith.cmpi ne, %57, %c0_i32_44 : i32
      scf.if %58 {
        %c0_45 = arith.constant 0 : index
        %c0_46 = arith.constant 0 : index
        %59 = vector.load %arg14[%c0_45, %c0_46] : memref<32x128xf32, #tpu.memory_space<vmem>>, vector<32x128xf32>
        %c0_47 = arith.constant 0 : index
        %c0_48 = arith.constant 0 : index
        %60 = vector.load %arg9[%c0_47, %c0_48] : memref<1x128xf32, #tpu.memory_space<vmem>>, vector<1x128xf32>
        %61 = vector.broadcast %60 : vector<1x128xf32> to vector<32x128xf32>
        %62 = arith.addf %59, %61 : vector<32x128xf32>
        %c0_49 = arith.constant 0 : index
        %c0_50 = arith.constant 0 : index
        %c0_51 = arith.constant 0 : index
        %63 = vector.load %arg10[%c0_49, %c0_50, %c0_51] : memref<1x32x128xf32, #tpu.memory_space<vmem>>, vector<1x32x128xf32>
        %64 = vector.shape_cast %63 : vector<1x32x128xf32> to vector<32x128xf32>
        %65 = vector.shape_cast %62 : vector<32x128xf32> to vector<1x32x128xf32>
        tpu.vector_store %arg10[%c0_49, %c0_50, %c0_51], %65 {strides = array<i32>} : memref<1x32x128xf32, #tpu.memory_space<vmem>>, vector<1x32x128xf32>,
      } else {
      }
    } else {
    }
    return
  }
  func.func @transform_0(%arg0: i32, %arg1: i32, %arg2: i32, %arg3: i32) -> (i32, i32, i32, i32) {
    %c0_i32 = arith.constant 0 : i32
    %c0_i32_0 = arith.constant 0 : i32
    return %arg0, %arg2, %arg1, %c0_i32 : i32, i32, i32, i32
  }
  func.func @transform_1(%arg0: i32, %arg1: i32, %arg2: i32, %arg3: i32) -> (i32, i32, i32, i32) {
    %c0_i32 = arith.constant 0 : i32
    %c0_i32_0 = arith.constant 0 : i32
    return %arg0, %arg2, %c0_i32, %arg3 : i32, i32, i32, i32
  }
  func.func @transform_2(%arg0: i32, %arg1: i32, %arg2: i32, %arg3: i32) -> (i32, i32, i32, i32) {
    %c0_i32 = arith.constant 0 : i32
    %c0_i32_0 = arith.constant 0 : i32
    return %arg0, %arg2, %arg3, %c0_i32 : i32, i32, i32, i32
  }
  func.func @transform_3(%arg0: i32, %arg1: i32, %arg2: i32, %arg3: i32) -> (i32, i32, i32) {
    %c0_i32 = arith.constant 0 : i32
    return %arg0, %arg1, %arg3 : i32, i32, i32
  }
  func.func @transform_4(%arg0: i32, %arg1: i32, %arg2: i32, %arg3: i32) -> (i32, i32, i32) {
    %c0_i32 = arith.constant 0 : i32
    %c0_i32_0 = arith.constant 0 : i32
    %c0_i32_1 = arith.constant 0 : i32
    %c0_i32_2 = arith.constant 0 : i32
    return %c0_i32, %c0_i32_0, %c0_i32_1 : i32, i32, i32
  }
  func.func @transform_5(%arg0: i32, %arg1: i32, %arg2: i32, %arg3: i32) -> (i32, i32) {
    %c0_i32 = arith.constant 0 : i32
    %c0_i32_0 = arith.constant 0 : i32
    %c0_i32_1 = arith.constant 0 : i32
    return %c0_i32, %c0_i32_0 : i32, i32
  }
  func.func @transform_6(%arg0: i32, %arg1: i32, %arg2: i32, %arg3: i32) -> (i32, i32, i32) {
    %c0_i32 = arith.constant 0 : i32
    %c0_i32_0 = arith.constant 0 : i32
    return %arg0, %arg1, %c0_i32 : i32, i32, i32
  }
}

</mosaic_0001>

<bundles_post_ra>
// kernel: tpu_custom_call.1
= control target key start
LH: loop header
LB: loop body
LE: loop exit
PB: predicated region body
PF: predicated region fallthrough
CT: control target
= control target key end

     0   :  { %11 = vsyncpa [#allocation7], 0  ;;  %s1954_s0 = inlined_call_operand.vmem [shape: f32[2,4,64,32], index: 0, kind: input, shape index: {}]   ;;  %s1955_s1 = inlined_call_operand.vmem [shape: f32[2,4,32,64], index: 1, kind: input, shape index: {}]   ;;  %s1956_s2 = inlined_call_operand.vmem [shape: f32[2,4,64,32], index: 2, kind: input, shape index: {}]   ;;  %s1957_s3 = inlined_call_operand.vmem [shape: s8[2,64,64], index: 3, kind: input, shape index: {}]   ;;  %s1958_s4 = inlined_call_operand.vmem [shape: f32[4,32,128], index: 4, kind: input, shape index: {}]   ;;  %s1959_s5 = inlined_call_operand.vmem [shape: f32[1,128], index: 5, kind: input, shape index: {}]   ;;  %s1960_s6 = inlined_call_operand.hbm [shape: f32[2,64,128], index: 6, kind: output, shape index: {}]  }
   0x1   :  { %13 = vsyncpa [#allocation7 + $0x1], 0  ;;  %s1641_s21 = smov 0   ;;  %s1643_s22 = smov 0  }
   0x2   :  { %s1645_s23 = smov 0   ;;  %s1647_s24 = smov 0  }
   0x3   :  { %s1649_s25 = smov 0   ;;  %s1651_s26 = smov 0  }
   0x4   :  { %s1653_s27 = smov 0   ;;  %s1655_s28 = smov 0  }
   0x5   :  { %s1657_s29 = smov 0   ;;  %s1659_s30 = smov 0  }
   0x6 LB: > { %1968 = sst [smem:[#allocation9_spill]] %s1570_s23  ;;  %s1219_s7 = sadd.s32 4294967295, %s1598_s30   ;;  %s1598_s30 = sphi %s1659_s30, %s19_s30   ;;  %s1594_s29 = sphi %s1657_s29, %s1986_s29   ;;  %s1590_s28 = sphi %s1655_s28, %s1985_s28   ;;  %s1586_s27 = sphi %s1653_s27, %s1984_s27   ;;  %s1582_s26 = sphi %s1651_s26, %s1983_s26   ;;  %s1578_s25 = sphi %s1649_s25, %s1982_s25   ;;  %s1574_s24 = sphi %s1647_s24, %s1981_s24   ;;  %s1570_s23 = sphi %s1645_s23, %s1980_s23   ;;  %s1566_s22 = sphi %s1643_s22, %s1988_s22   ;;  %s1562_s21 = sphi %s1641_s21, %s1987_s21  }
   0x7   : > { %1969 = sst [smem:[#allocation10_spill]] %s1586_s27  ;;  %s1220_s8 = sadd.s32 4294967294, %s1598_s30  }
   0x8   : > { %1970 = sst [smem:[#allocation11_spill]] %s1590_s28  ;;  %s37_s9 = sadd.s32 1, %s1586_s27 }
   0x9   : > { %1971 = sst [smem:[#allocation12_spill]] %s1594_s29  ;;  %p39_p0 = scmp.ge.s32.totalorder %s37_s9, 4 }
   0xa   : > { %s41_s10 = sadd.s32 1, %s1590_s28  ;;  %s45_s11 = sadd.s32 1, %s1594_s29 }
   0xb   : > { %p226_p1 = scmp.ne.s32.totalorder %s1570_s23, %s1566_s22  ;;  %s1990_s9 = smov (%p39_p0, %s37_s9), 0 }
   0xc   : > { %1972 = sst [smem:[#allocation13_spill]] %s1990_s9  ;;  %s1992_s10 = smov (!%p39_p0, %s41_s10), %s1590_s28 }
   0xd   : > { %p227_p2 = scmp.eq.s32.totalorder %s1219_s7, 15  ;;  %p232_p3 = scmp.ne.s32.totalorder %s1566_s22, %s1562_s21 }
   0xe   : > { %p43_p4 = scmp.ge.s32.totalorder %s1992_s10, 2  ;;  %p233_p5 = scmp.eq.s32.totalorder %s1220_s8, 15 }
   0xf   : > { %p1703_p6 = por %p227_p2, %p226_p1  ;;  %p1223_p8 = scmp.ge.s32.totalorder %s1598_s30, 1 }
  0x10   : > { %s1994_s10 = smov (%p43_p4, %s1992_s10), 0  ;;  %s1996_s11 = smov (!%p43_p4, %s45_s11), %s1594_s29 }
  0x11   : > { %1974 = sst [smem:[#allocation14_spill]] %s1994_s10  ;;  %p1710_p7 = por %p233_p5, %p232_p3 }
  0x12   : > { %p47_p9 = scmp.ge.s32.totalorder %s1996_s11, 2  ;;  %p320_p10 = scmp.lt.s32.totalorder %s1598_s30, 17 }
  0x13   : > { %s212_s14 = ssub.s32 %s1590_s28, %s1994_s10  ;;  %s216_s17 = sadd.s32 1, %s1570_s23 }
  0x14   : > { %s1998_s11 = smov (%p47_p9, %s1996_s11), 0  ;;  %p321_p11 = pnand %p1223_p8, %p320_p10 }
  0x15   : > { %1976 = sst [smem:[#allocation15_spill]] %s1998_s11  ;;  %s211_s15 = ssub.s32 %s1594_s29, %s1998_s11  ;;  %vm461_vm0 = vcmask (!%p321_p11), 261120   ;;  %v1600_v11 = vmov (!%p321_p11), 0   ;;  %vm452_vm6 = vcmask (!%p321_p11), 7168   ;;  %v1601_v29 = vmov (!%p321_p11), -1e+30  }
  0x16   : > { %s213_s16 = sor.u32 %s212_s14, %s211_s15  ;;  %324 = sbr.rel (%p321_p11) target bundleno = 1116 (0x45c), region = 44  ;;  %1462 = vset.pattern.permute.xlu0 (!%p321_p11), %v1600_v11  ;;  %1463 = vset.pattern.permute.xlu1 (!%p321_p11), %v1600_v11  ;;  %453 = vst.msk [vmem:[#allocation2] sm:$0xff] (!%p321_p11), %vm452_vm6, %v1601_v29  ;;  %454 = vst.msk [vmem:[#allocation2 + $0x8] sm:$0xff] (!%p321_p11), %vm452_vm6, %v1601_v29  ;;  %vm619_vm9 = vcmask (!%p321_p11), 523264   ;;  %v1602_v46 = vmov (!%p321_p11), 0.0  }
  0x17   : > { %p214_p12 = scmp.eq.s32.totalorder %s213_s16, 0  ;;  %s1964_s19 = sand.u32 (!%p321_p11), 1, %s1566_s22   ;;  %455 = vst.msk [vmem:[#allocation2 + $0x10] sm:$0xff] (!%p321_p11), %vm452_vm6, %v1601_v29  ;;  %456 = vst.msk [vmem:[#allocation2 + $0x18] sm:$0xff] (!%p321_p11), %vm452_vm6, %v1601_v29 }
  0x18   : > { %p395_p13 = scmp.lt.s32.totalorder (!%p321_p11), %s1582_s26, 1  ;;  %s1730_s20 = sshll.u32 (!%p321_p11), %s1964_s19, 5  ;;  %457 = vst.msk [vmem:[#allocation3] sm:$0xff] (!%p321_p11), %vm452_vm6, %v1602_v46  ;;  %458 = vst.msk [vmem:[#allocation3 + $0x8] sm:$0xff] (!%p321_p11), %vm452_vm6, %v1602_v46 }
  0x19   : > { %s1724_s18 = scalar_select %p214_p12, %s1570_s23, %s216_s17  }
  0x1a   : > { %p397_p0 = scmp.lt.s32.totalorder (!%p321_p11), %s1574_s24, 3  ;;  %s1734_s7 = sshll.u32 (!%p321_p11), %s1578_s25, 2  ;;  %459 = vst.msk [vmem:[#allocation3 + $0x10] sm:$0xff] (!%p321_p11), %vm452_vm6, %v1602_v46  ;;  %460 = vst.msk [vmem:[#allocation3 + $0x18] sm:$0xff] (!%p321_p11), %vm452_vm6, %v1602_v46 }
  0x1b   : > { %1977 = sst [smem:[#allocation16_spill]] %s1724_s18  ;;  %p399_p1 = scmp.lt.s32.totalorder (!%p321_p11), %s1734_s7, 7  ;;  %462 = vst.msk [vmem:[#allocation4] sm:$0xff] (!%p321_p11), %vm461_vm0, %v1602_v46  ;;  %463 = vst.msk [vmem:[#allocation4 + $0x8] sm:$0xff] (!%p321_p11), %vm461_vm0, %v1602_v46 }
  0x1c   : > { %p436_p2 = scmp.lt.s32.totalorder (!%p321_p11), %s1578_s25, 1  ;;  %464 = vst.msk [vmem:[#allocation4 + $0x10] sm:$0xff] (!%p321_p11), %vm461_vm0, %v1602_v46  ;;  %465 = vst.msk [vmem:[#allocation4 + $0x18] sm:$0xff] (!%p321_p11), %vm461_vm0, %v1602_v46  ;;  %p1250_p3 = scmp.ne.s32.totalorder (!%p321_p11), %s1574_s24, 0 }
  0x1d   : > { %s1737_s8 = scalar_select %p395_p13, %s1582_s26, 1  ;;  %v1791_v47 = vld [vmem:[#allocation2] sm:$0xff]  ;;  %v1801_v50 = vld [vmem:[#allocation2 + $0x8] sm:$0xff] }
  0x1e   : > { %s398_s14 = scalar_select %p397_p0, %s1574_s24, 3  ;;  %v1803_v51 = vld [vmem:[#allocation2 + $0x10] sm:$0xff]  ;;  %v1816_v60 = vld [vmem:[#allocation2 + $0x18] sm:$0xff] }
  0x1f   : > { %s1230_s15 = sshll.u32 %s1737_s8, 4  ;;  %s1227_s10 = sshll.u32 %s1737_s8, 5 }
  0x20   : > { %s1229_s16 = sshll.u32 %s398_s14, 2  ;;  %s1226_s17 = sshll.u32 %s398_s14, 3 }
  0x21   : > { %s417_s11 = sadd.s32 %s1230_s15, %s1229_s16  ;;  %s1743_s29 = sadd.s32 %s1227_s10, %s1226_s17 }
  0x22   : > { %s1231_s9 = sshll.u32 %s417_s11, 3  ;;  %s2000_s25 = smov (!%p436_p2, %s1578_s25), 1 }
  0x23   : > { %s419_s27 = scalar_lea.vmem %s1955_s1, %s1231_s9 }
  0x24   : > { %v470_v0 = vld [vmem:[%s419_s27] sm:$0xff]  ;;  %v471_v1 = vld [vmem:[%s419_s27 + $0x8] sm:$0xff]  ;;  %v472_v2 = vld [vmem:[%s419_s27 + $0x10] sm:$0xff]  ;;  %s400_s18 = scalar_select %p399_p1, %s1734_s7, 7 }
  0x25   : > { %v1338_v3 = vpack.c.bf16 %v471_v1, %v470_v0  ;;  %v473_v4 = vld [vmem:[%s419_s27 + $0x18] sm:$0xff] }
  0x26   : > { %v1342_v5 = vpack.c.bf16 %v473_v4, %v472_v2  ;;  %s402_s23 = sadd.s32 %s1226_s17, %s400_s18 }
  0x27   : > { %1339 = vmatprep.subr.bf16.mxu0 %v1338_v3  ;;  %s404_s14 = sadd.s32 %s1227_s10, %s402_s23  ;;  %s1235_s23 = sshll.u32 %s1737_s8, 1 }
  0x28   : > { %1341 = vmatpush3.bf16.msra.mxu0 %v1338_v3  ;;  %s1228_s11 = sshll.u32 %s404_s14, 3  ;;  %s442_s27 = sadd.s32 %s1235_s23, %s2000_s25 }
  0x29   : > { %1343 = vmatprep.subr.bf16.mxu0 %v1342_v5  ;;  %s406_s9 = scalar_lea.vmem %s1954_s0, %s1228_s11  ;;  %s1236_s10 = sshll.u32 %s442_s27, 3 }
  0x2a   : > { %v466_v6 = vld [vmem:[%s406_s9] sm:$0xff]  ;;  %v467_v7 = vld [vmem:[%s406_s9 + $0x8] sm:$0xff]  ;;  %v468_v8 = vld [vmem:[%s406_s9 + $0x10] sm:$0xff]  ;;  %s444_s16 = scalar_lea.vmem %s1957_s3, %s1236_s10  ;;  %s1234_s25 = sshll.u32 %s1743_s29, 3 }
  0x2b   : > { %1296 = vmatprep.mubr.msk.f32.mxu0 %vm461_vm0, %v466_v6  ;;  %v469_v9 = vld [vmem:[%s406_s9 + $0x18] sm:$0xff]  ;;  %v580_v10 = vld [vmem:[%s444_s16] sm:$0xff]  ;;  %s1796_s14 = scalar_lea.vmem %s1956_s2, %s1234_s25  ;;  %s1245_s29 = sshll.u32 %s1574_s24, 5 }
  0x2c   : > { %1345 = vmatpush3.bf16.msra.mxu0 %v1342_v5  ;;  %vm581_vm1 = vnez %v580_v10  ;;  %v474_v53 = vld [vmem:[%s1796_s14] sm:$0xff]  ;;  %v475_v54 = vld [vmem:[%s1796_s14 + $0x8] sm:$0xff]  ;;  %v476_v63 = vld [vmem:[%s1796_s14 + $0x10] sm:$0xff]  ;;  %s1853_s28 = scalar_lea.vmem %s1958_s4, %s1245_s29  ;;  %s1872_s9 = scalar_lea.vmem [#allocation6], %s1730_s20 }
  0x2d   : > { %v582_v12 = vsel %vm581_vm1, 16843009, %v1600_v11  ;;  %v1346_v57 = vpack.c.bf16 %v475_v54, %v474_v53  ;;  %v477_v0 = vld [vmem:[%s1796_s14 + $0x18] sm:$0xff]  ;;  %v478_v5 = vld [vmem:[%s1796_s14 + $0x20] sm:$0xff]  ;;  %v479_v6 = vld [vmem:[%s1796_s14 + $0x28] sm:$0xff] }
  0x2e   : > { %v584_v13 = vunpack.c.1.s8 %v582_v12  ;;  %v583_v14 = vunpack.c.0.s8 %v582_v12  ;;  %v585_v19 = vunpack.c.2.s8 %v582_v12  ;;  %v586_v23 = vunpack.c.3.s8 %v582_v12  ;;  %v683_v53 = vld [vmem:[#allocation3 + $0x18] sm:$0xff] }
  0x2f   : > { %1297 = vmatmul.mubr.msk.f32.vlgmr.msra.gmra.mrb[0].mxu0 %vm461_vm0, %v467_v7  ;;  %1347 = vmatprep.subr.bf16.mxu1 %v1346_v57  ;;  %v1350_v2 = vpack.c.bf16 %v477_v0, %v476_v63  ;;  %v1354_v7 = vpack.c.bf16 %v479_v6, %v478_v5  ;;  %v890_v63 = vld [vmem:[%s1853_s28 + $0x18] sm:$0xff]  ;;  %v710_v6 = vld [vmem:[#allocation4 + $0x8] sm:$0xff] }
  0x30   : > { %1299 = vmatprep.mubr.msk.f32.mxu0 %vm461_vm0, %v468_v8  ;;  %v589_v15 = vpack.c.b16 %v584_v13, %v584_v13  ;;  %v587_v16 = vpack.c.b16 %v583_v14, %v583_v14  ;;  %v591_v21 = vpack.c.b16 %v585_v19, %v585_v19  ;;  %v593_v25 = vpack.c.b16 %v586_v23, %v586_v23  ;;  %v480_v8 = vld [vmem:[%s1796_s14 + $0x30] sm:$0xff] }
  0x31   : > { %1349 = vmatpush3.bf16.msra.mxu1 %v1346_v57 }
  0x32   : > { %v590_v17 = vpack.c.b8 %v589_v15, %v589_v15  ;;  %v588_v18 = vpack.c.b8 %v587_v16, %v587_v16  ;;  %v592_v24 = vpack.c.b8 %v591_v21, %v591_v21  ;;  %v594_v26 = vpack.c.b8 %v593_v25, %v593_v25  ;;  %1351 = vmatprep.subr.bf16.mxu1 %v1350_v2 }
  0x33   : > { %1300 = vmatmul.mubr.msk.f32.gmra.mrb[2].mxu0 %vm461_vm0, %v469_v9  ;;  %v481_v9 = vld [vmem:[%s1796_s14 + $0x38] sm:$0xff] }
  0x34   : > { %vm596_vm2 = vnez %v590_v17  ;;  %vm595_vm3 = vnez %v588_v18  ;;  %vm597_vm4 = vnez %v592_v24  ;;  %vm598_vm5 = vnez %v594_v26 }
  0x35   : > { %v600_v20 = vsel %vm596_vm2, 16843009, %v1600_v11  ;;  %v599_v22 = vsel %vm595_vm3, 16843009, %v1600_v11  ;;  %v601_v27 = vsel %vm597_vm4, 16843009, %v1600_v11  ;;  %1353 = vmatpush3.bf16.msra.mxu1 %v1350_v2  ;;  %v1358_v10 = vpack.c.bf16 %v481_v9, %v480_v8 }
  0x36   : > { %v602_v28 = vsel %vm598_vm5, 16843009, %v1600_v11  ;;  %v604_v30 = vunpack.c.0.s8 %v600_v20  ;;  %v603_v31 = vunpack.c.0.s8 %v599_v22  ;;  %v605_v33 = vunpack.c.0.s8 %v601_v27  ;;  %1355 = vmatprep.subr.bf16.mxu1 %v1354_v7  ;;  %v709_v8 = vld [vmem:[#allocation4] sm:$0xff] }
  0x37   : > { %v606_v32 = vunpack.c.0.s8 %v602_v28 }
  0x38   : > { %vm608_vm7 = vcmp.ne.s32.totalorder %v604_v30, 0  ;;  %vm607_vm8 = vcmp.ne.s32.totalorder %v603_v31, 0  ;;  %vm609_vm11 = vcmp.ne.s32.totalorder %v605_v33, 0 }
  0x39   : > { %vm610_vm10 = vcmp.ne.s32.totalorder %v606_v32, 0  ;;  %1357 = vmatpush3.bf16.msra.mxu1 %v1354_v7 }
  0x3a   : > { %1359 = vmatprep.subr.bf16.mxu1 %v1358_v10 }
  0x3d   : > { %1361 = vmatpush3.bf16.msra.mxu1 %v1358_v10 }
 0x102   : > { %v1298_v34 = vpop.f32.mrb[0].mxu0 }
 0x103   : > { %v1766_v35 = vsel %vm608_vm7, -1e+30, %v1298_v34  ;;  %v561_v36 = vpop.f32.mrb[1].mxu0 }
 0x104   : > { %v1768_v37 = vsel %vm607_vm8, -1e+30, %v561_v36  ;;  %v623_v43 = vsel %vm619_vm9, %v1766_v35, -inf }
 0x105   : > { %v620_v38 = vsel %vm619_vm9, %v1768_v37, -inf }
 0x106   : > { %621 = vmax.xlane.f32.xlu0 %v620_v38  ;;  %v1301_v39 = vpop.f32.mrb[2].mxu0 }
 0x107   : > { %v1772_v40 = vsel %vm610_vm10, -1e+30, %v1301_v39  ;;  %v571_v41 = vpop.f32.mrb[3].mxu0  ;;  %v887_v39 = vld [vmem:[%s1853_s28] sm:$0xff] }
 0x108   : > { %v1774_v42 = vsel %vm609_vm11, -1e+30, %v571_v41  ;;  %v629_v45 = vsel %vm619_vm9, %v1772_v40, -inf }
 0x109   : > { %v626_v44 = vsel %vm619_vm9, %v1774_v42, -inf }
 0x10a   : > { %624 = vmax.xlane.f32.xlu0 %v623_v43  ;;  %627 = vmax.xlane.f32.xlu1 %v626_v44 }
 0x10e   : > { %630 = vmax.xlane.f32.xlu1 %v629_v45  ;;  %v681_v45 = vld [vmem:[#allocation3 + $0x8] sm:$0xff] }
 0x193   : > { %v622_v48 = vpop.xlane.xlu0 %621 }
 0x194   : > { %v1799_v49 = vmax.f32 %v1791_v47, %v622_v48 }
 0x196   : > { %v636_v52 = vsub.f32 %v1791_v47, %v1799_v49  ;;  %842 = vst.msk [vmem:[#allocation2] sm:$0xff] %vm452_vm6, %v1799_v49  ;;  %650 = vperm.xlu0 %1462, %v1799_v49   ;;  %v682_v49 = vld [vmem:[#allocation3 + $0x10] sm:$0xff] }
 0x197   : > { %v625_v55 = vpop.xlane.xlu0 %624  ;;  %v628_v56 = vpop.xlane.xlu1 %627 }
 0x198   : > { %v633_v58 = vmax.f32 %v1801_v50, %v625_v55  ;;  %v1814_v59 = vmax.f32 %v1803_v51, %v628_v56  ;;  %v640_v32 = vmul.f32 1.442695, %v636_v52 }
 0x19a   : > { %v637_v61 = vsub.f32 %v1801_v50, %v633_v58  ;;  %843 = vst.msk [vmem:[#allocation2 + $0x8] sm:$0xff] %vm452_vm6, %v633_v58  ;;  %v638_v62 = vsub.f32 %v1803_v51, %v1814_v59  ;;  %844 = vst.msk [vmem:[#allocation2 + $0x10] sm:$0xff] %vm452_vm6, %v1814_v59  ;;  %655 = vperm.xlu1 %1463, %v633_v58  }
 0x19b   : > { %v631_v1 = vpop.xlane.xlu1 %630 }
 0x19c   : > { %v635_v3 = vmax.f32 %v1816_v60, %v631_v1  ;;  %v642_v30 = vmul.f32 1.442695, %v637_v61  ;;  %v644_v33 = vmul.f32 1.442695, %v638_v62  ;;  %v889_v62 = vld [vmem:[%s1853_s28 + $0x10] sm:$0xff] }
 0x19d   : > { %v1366_v1 = vpack.c.bf16 %v890_v63, %v889_v62 }
 0x19e   : > { %v639_v4 = vsub.f32 %v1816_v60, %v635_v3  ;;  %845 = vst.msk [vmem:[#allocation2 + $0x18] sm:$0xff] %vm452_vm6, %v635_v3  ;;  %660 = vperm.xlu1 %1463, %v1814_v59  }
 0x1a0   : > { %v646_v34 = vmul.f32 1.442695, %v639_v4 }
 0x1a2   : > { %665 = vperm.xlu1 %1463, %v635_v3  }
 0x215   : > { %v651_v11 = vpop.permute.xlu0 %650 }
 0x216   : > { %v668_v12 = vsub.f32 %v1768_v37, %v651_v11 }
 0x218   : > { %v672_v13 = vmul.f32 1.442695, %v668_v12 }
 0x219   : > { %v656_v14 = vpop.permute.xlu1 %655 }
 0x21a   : > { %1464 = vpow2.f32 %v672_v13  ;;  %v669_v15 = vsub.f32 %v1766_v35, %v656_v14 }
 0x21c   : > { %v674_v16 = vmul.f32 1.442695, %v669_v15 }
 0x21d   : > { %v661_v17 = vpop.permute.xlu1 %660 }
 0x21e   : > { %1466 = vpow2.f32 %v674_v16  ;;  %v670_v18 = vsub.f32 %v1774_v42, %v661_v17  ;;  %v680_v42 = vld [vmem:[#allocation3] sm:$0xff]  ;;  %v712_v16 = vld [vmem:[#allocation4 + $0x18] sm:$0xff] }
 0x220   : > { %v676_v19 = vmul.f32 1.442695, %v670_v18  ;;  %v711_v18 = vld [vmem:[#allocation4 + $0x10] sm:$0xff] }
 0x221   : > { %v666_v20 = vpop.permute.xlu1 %665 }
 0x222   : > { %1468 = vpow2.f32 %v676_v19  ;;  %v671_v21 = vsub.f32 %v1772_v40, %v666_v20  ;;  %v888_v40 = vld [vmem:[%s1853_s28 + $0x8] sm:$0xff] }
 0x223   : > { %v1362_v41 = vpack.c.bf16 %v888_v40, %v887_v39 }
 0x224   : > { %v1465_v22 = vpop.eup %1464  ;;  %v678_v23 = vmul.f32 1.442695, %v671_v21 }
 0x225   : > { %1318 = vmatprep.mubr.msk.f32.mxu1 %vm619_vm9, %v1465_v22  ;;  %v688_v24 = vsel %vm619_vm9, %v1465_v22, 0.0  ;;  %1363 = vmatprep.subr.bf16.mxu0 %v1362_v41 }
 0x226   : > { %1470 = vpow2.f32 %v678_v23  ;;  %689 = vadd.xlane.f32.xlu1 %v688_v24  ;;  %1365 = vmatpush3.bf16.msra.mxu0 %v1362_v41 }
 0x227   : > { %1472 = vpow2.f32 %v642_v30  ;;  %1367 = vmatprep.subr.bf16.mxu0 %v1366_v1 }
 0x228   : > { %v1467_v25 = vpop.eup %1466  ;;  %1474 = vpow2.f32 %v640_v32 }
 0x229   : > { %1319 = vmatmul.mubr.msk.f32.vlgmr.msra.gmra.mrb[0].mxu1 %vm619_vm9, %v1467_v25  ;;  %v691_v26 = vsel %vm619_vm9, %v1467_v25, 0.0  ;;  %1476 = vpow2.f32 %v644_v33 }
 0x22a   : > { %692 = vadd.xlane.f32.xlu0 %v691_v26  ;;  %1478 = vpow2.f32 %v646_v34  ;;  %1369 = vmatpush3.bf16.msra.mxu0 %v1366_v1 }
 0x22c   : > { %v1469_v27 = vpop.eup %1468 }
 0x22d   : > { %1321 = vmatprep.mubr.msk.f32.mxu1 %vm619_vm9, %v1469_v27  ;;  %v694_v28 = vsel %vm619_vm9, %v1469_v27, 0.0 }
 0x22e   : > { %695 = vadd.xlane.f32.xlu1 %v694_v28 }
 0x230   : > { %v1471_v29 = vpop.eup %1470 }
 0x231   : > { %1322 = vmatmul.mubr.msk.f32.gmra.mrb[2].mxu1 %vm619_vm9, %v1471_v29  ;;  %v697_v31 = vsel %vm619_vm9, %v1471_v29, 0.0  ;;  %v1473_v35 = vpop.eup %1472 }
 0x232   : > { %698 = vadd.xlane.f32.xlu1 %v697_v31  ;;  %v1475_v36 = vpop.eup %1474  ;;  %v685_v47 = vmul.f32 %v1473_v35, %v681_v45 }
 0x233   : > { %v1477_v37 = vpop.eup %1476  ;;  %v684_v43 = vmul.f32 %v1475_v36, %v680_v42 }
 0x234   : > { %v1479_v38 = vpop.eup %1478  ;;  %v686_v51 = vmul.f32 %v1477_v37, %v682_v49 }
 0x235   : > { %v687_v56 = vmul.f32 %v1479_v38, %v683_v53 }
 0x240   : > { %720 = vperm.xlu0 %1462, %v1473_v35  }
 0x243   : > { %715 = vperm.xlu1 %1463, %v1475_v36  }
 0x247   : > { %725 = vperm.xlu1 %1463, %v1477_v37  }
 0x24b   : > { %730 = vperm.xlu1 %1463, %v1479_v38  }
 0x2b3   : > { %v690_v44 = vpop.xlane.xlu1 %689 }
 0x2b4   : > { %v700_v46 = vadd.f32 %v690_v44, %v684_v43 }
 0x2b6   : > { %705 = vst.msk [vmem:[#allocation3] sm:$0xff] %vm452_vm6, %v700_v46 }
 0x2b7   : > { %v693_v48 = vpop.xlane.xlu0 %692 }
 0x2b8   : > { %v701_v50 = vadd.f32 %v693_v48, %v685_v47 }
 0x2ba   : > { %706 = vst.msk [vmem:[#allocation3 + $0x8] sm:$0xff] %vm452_vm6, %v701_v50 }
 0x2bb   : > { %v696_v52 = vpop.xlane.xlu1 %695 }
 0x2bc   : > { %v702_v54 = vadd.f32 %v696_v52, %v686_v51 }
 0x2bd   : > { %v853_v55 = vld [vmem:[#allocation3] sm:$0xff] }
 0x2be   : > { %707 = vst.msk [vmem:[#allocation3 + $0x10] sm:$0xff] %vm452_vm6, %v702_v54  ;;  %1480 = vrcp.f32 %v853_v55 }
 0x2bf   : > { %v699_v57 = vpop.xlane.xlu1 %698  ;;  %v721_v7 = vpop.permute.xlu0 %720 }
 0x2c0   : > { %v703_v58 = vadd.f32 %v699_v57, %v687_v56  ;;  %v734_v10 = vmul.f32 %v721_v7, %v710_v6 }
 0x2c1   : > { %v854_v59 = vld [vmem:[#allocation3 + $0x8] sm:$0xff] }
 0x2c2   : > { %708 = vst.msk [vmem:[#allocation3 + $0x18] sm:$0xff] %vm452_vm6, %v703_v58  ;;  %1482 = vrcp.f32 %v854_v59 }
 0x2c3   : > { %v716_v5 = vpop.permute.xlu1 %715 }
 0x2c4   : > { %v733_v11 = vmul.f32 %v716_v5, %v709_v8 }
 0x2c5   : > { %v855_v60 = vld [vmem:[#allocation3 + $0x10] sm:$0xff] }
 0x2c6   : > { %1484 = vrcp.f32 %v855_v60 }
 0x2c7   : > { %v726_v9 = vpop.permute.xlu1 %725 }
 0x2c8   : > { %v1481_v61 = vpop.eup %1480  ;;  %v735_v20 = vmul.f32 %v726_v9, %v711_v18 }
 0x2c9   : > { %863 = vperm.xlu1 %1463, %v1481_v61   ;;  %v856_v0 = vld [vmem:[#allocation3 + $0x18] sm:$0xff] }
 0x2ca   : > { %1486 = vrcp.f32 %v856_v0 }
 0x2cb   : > { %v731_v17 = vpop.permute.xlu1 %730 }
 0x2cc   : > { %v1483_v2 = vpop.eup %1482  ;;  %v736_v19 = vmul.f32 %v731_v17, %v712_v16 }
 0x2cd   : > { %868 = vperm.xlu0 %1462, %v1483_v2  }
 0x2d0   : > { %v1485_v3 = vpop.eup %1484 }
 0x2d1   : > { %873 = vperm.xlu1 %1463, %v1485_v3  }
 0x2d4   : > { %v1487_v4 = vpop.eup %1486 }
 0x2d5   : > { %878 = vperm.xlu0 %1462, %v1487_v4  }
 0x2fc   : > { %v1320_v12 = vpop.f32.mrb[0].mxu1 }
 0x2fd   : > { %v835_v13 = vadd.f32 %v1320_v12, %v734_v10  ;;  %v815_v14 = vpop.f32.mrb[1].mxu1 }
 0x2fe   : > { %v834_v15 = vadd.f32 %v815_v14, %v733_v11 }
 0x2ff   : > { %839 = vst.msk [vmem:[#allocation4 + $0x8] sm:$0xff] %vm461_vm0, %v835_v13 }
 0x300   : > { %838 = vst.msk [vmem:[#allocation4] sm:$0xff] %vm461_vm0, %v834_v15 }
 0x304   : > { %v1323_v21 = vpop.f32.mrb[2].mxu1 }
 0x305   : > { %v837_v22 = vadd.f32 %v1323_v21, %v736_v19  ;;  %v825_v23 = vpop.f32.mrb[3].mxu1 }
 0x306   : > { %v836_v24 = vadd.f32 %v825_v23, %v735_v20  ;;  %v850_v28 = vld [vmem:[#allocation4 + $0x8] sm:$0xff] }
 0x307   : > { %841 = vst.msk [vmem:[#allocation4 + $0x18] sm:$0xff] %vm461_vm0, %v837_v22  ;;  %v849_v25 = vld [vmem:[#allocation4] sm:$0xff] }
 0x308   : > { %840 = vst.msk [vmem:[#allocation4 + $0x10] sm:$0xff] %vm461_vm0, %v836_v24 }
 0x30e   : > { %v852_v35 = vld [vmem:[#allocation4 + $0x18] sm:$0xff] }
 0x30f   : > { %v851_v31 = vld [vmem:[#allocation4 + $0x10] sm:$0xff] }
 0x348   : > { %v864_v26 = vpop.permute.xlu1 %863 }
 0x349   : > { %v881_v27 = vmul.f32 %v864_v26, %v849_v25 }
 0x34b   : > { %1332 = vmatprep.mubr.msk.f32.mxu0 %vm461_vm0, %v881_v27 }
 0x34c   : > { %v869_v29 = vpop.permute.xlu0 %868 }
 0x34d   : > { %v882_v30 = vmul.f32 %v869_v29, %v850_v28 }
 0x34f   : > { %1333 = vmatmul.mubr.msk.f32.vlgmr.msra.gmra.mrb[4].mxu0 %vm461_vm0, %v882_v30 }
 0x350   : > { %v874_v32 = vpop.permute.xlu1 %873 }
 0x351   : > { %v883_v33 = vmul.f32 %v874_v32, %v851_v31 }
 0x353   : > { %1335 = vmatprep.mubr.msk.f32.mxu0 %vm461_vm0, %v883_v33 }
 0x354   : > { %v879_v34 = vpop.permute.xlu0 %878 }
 0x355   : > { %v884_v36 = vmul.f32 %v879_v34, %v852_v35 }
 0x357   : > { %1336 = vmatmul.mubr.msk.f32.gmra.mrb[6].mxu0 %vm461_vm0, %v884_v36 }
 0x422   : > { %v1334_v37 = vpop.f32.mrb[4].mxu0 }
 0x423   : > { %v969_v38 = vpop.f32.mrb[5].mxu0  ;;  %993 = vst [vmem:[#allocation5 + $0x8] sm:$0xff] (!%p1250_p3), %v1334_v37 }
 0x424   : > { %992 = vst [vmem:[#allocation5] sm:$0xff] (!%p1250_p3), %v969_v38 }
 0x425   : > { %991 = sbr.rel (%p1250_p3) target bundleno = 1069 (0x42d), region = 56 }
 0x42a   : > { %v1337_v39 = vpop.f32.mrb[6].mxu0 }
 0x42b   : > { %v979_v40 = vpop.f32.mrb[7].mxu0  ;;  %995 = vst [vmem:[#allocation5 + $0x18] sm:$0xff] (!%p1250_p3), %v1337_v39 }
 0x42c   : > { %994 = vst [vmem:[#allocation5 + $0x10] sm:$0xff] %v979_v40 }
 0x42d PF: > { %p1251_p4 = scmp.le.s32.totalorder %s1574_s24, 0 }
 0x42e   : > { %v1000_v41 = vld [vmem:[#allocation5] sm:$0xff] (!%p1251_p4)  ;;  %v1001_v42 = vld [vmem:[#allocation5 + $0x8] sm:$0xff] (!%p1251_p4) }
 0x42f   : > { %999 = sbr.rel (%p1251_p4) target bundleno = 1079 (0x437), region = 60  ;;  %v1004_v44 = vadd.f32 (!%p1251_p4), %v1000_v41, %v969_v38  ;;  %v1005_v45 = vadd.f32 (!%p1251_p4), %v1334_v37, %v1001_v42 }
 0x431   : > { %1008 = vst [vmem:[#allocation5] sm:$0xff] (!%p1251_p4), %v1004_v44  ;;  %1009 = vst [vmem:[#allocation5 + $0x8] sm:$0xff] (!%p1251_p4), %v1005_v45 }
 0x433   : > { %v1002_v43 = vld [vmem:[#allocation5 + $0x10] sm:$0xff] (!%p1251_p4)  ;;  %v1003_v47 = vld [vmem:[#allocation5 + $0x18] sm:$0xff] (!%p1251_p4) }
 0x434   : > { %v1006_v46 = vadd.f32 (!%p1251_p4), %v1002_v43, %v979_v40  ;;  %v1007_v48 = vadd.f32 (!%p1251_p4), %v1337_v39, %v1003_v47 }
 0x436   : > { %1010 = vst [vmem:[#allocation5 + $0x10] sm:$0xff] %v1006_v46  ;;  %1011 = vst [vmem:[#allocation5 + $0x18] sm:$0xff] %v1007_v48 }
 0x437 PF: > { %p1252_p5 = scmp.ne.s32.totalorder %s1574_s24, 3 }
 0x438   : > { %v1253_v50 = vld [vmem:[%s1959_s5] ss:$0 sm:$0xff] (!%p1252_p5) }
 0x439   : > { %1015 = sbr.rel (%p1252_p5) target bundleno = 1089 (0x441), region = 64  ;;  %v1016_v49 = vld [vmem:[#allocation5] sm:$0xff] (!%p1252_p5)  ;;  %v1017_v51 = vld [vmem:[#allocation5 + $0x8] sm:$0xff] (!%p1252_p5) }
 0x43a   : > { %v1027_v52 = vadd.f32 (!%p1252_p5), %v1253_v50, %v1016_v49  ;;  %v1028_v53 = vadd.f32 (!%p1252_p5), %v1253_v50, %v1017_v51 }
 0x43c   : > { %1031 = vst [vmem:[%s1872_s9] sm:$0xff] (!%p1252_p5), %v1027_v52  ;;  %1032 = vst [vmem:[%s1872_s9 + $0x8] sm:$0xff] (!%p1252_p5), %v1028_v53 }
 0x43d   : > { %v1018_v54 = vld [vmem:[#allocation5 + $0x10] sm:$0xff] (!%p1252_p5)  ;;  %v1019_v55 = vld [vmem:[#allocation5 + $0x18] sm:$0xff] (!%p1252_p5) }
 0x43e   : > { %v1029_v56 = vadd.f32 (!%p1252_p5), %v1253_v50, %v1018_v54  ;;  %v1030_v57 = vadd.f32 (!%p1252_p5), %v1253_v50, %v1019_v55 }
 0x440   : > { %1033 = vst [vmem:[%s1872_s9 + $0x10] sm:$0xff] %v1029_v56  ;;  %1034 = vst [vmem:[%s1872_s9 + $0x18] sm:$0xff] %v1030_v57 }
 0x441 PF: > { %s1256_s24 = sshll.u32 %s1582_s26, 3  ;;  %s1051_s10 = sshll.u32 %s1872_s9, 4  ;;  %s1887_s10 = int_to_ptr.vmem [resolvable:$true] %s1051_s10 }
 0x442   : > { %s1048_s27 = sadd.s32 %s1256_s24, %s1734_s7  ;;  %s1978_s8 = sand.u32 1, %s1566_s22  }
 0x443   : > { %s1257_s18 = sshll.u32 %s1048_s27, 7  ;;  %s1896_s17 = scalar_lea.sflag [#allocation7], %s1978_s8 }
 0x444   : > { %s1892_s25 = scalar_lea.hbm %s1960_s6, %s1257_s18  ;;  %s1488_s14 = scalar_lea.vmem %s1887_s10, 512 }
 0x445   : > { %p1489_p8 = scmp.ne.s32.totalorder %s1887_s10, %s1488_s14  ;;  %s1603_s26 = smov [#allocation6]  }
 0x446   : > { %s1492_s7 = sshll.u32 %s1603_s26, 4  ;;  %s1493_s7 = int_to_ptr.vmem [resolvable:$false] %s1492_s7 }
 0x447   : > { %p1490_p9 = pnand %p1489_p8, %p1703_p6  ;;  %s1494_s29 = scalar_lea.vmem %s1493_s7, 1024 }
 0x448   : > { %p1495_p11 = scmp.lt.s32.totalorder %s1887_s10, %s1493_s7  ;;  %p1496_p12 = scmp.lt.s32.totalorder %s1494_s29, %s1488_s14 }
 0x449   : > { %p1491_p10 = pneg %p1490_p9 }
 0x44a   : > { %p1497_p13 = por %p1496_p12, %p1495_p11 }
 0x44c   : > { %p1498_p0 = pnand %p1497_p13, %p1491_p10 }
 0x44e   : > { %1501 = shalt.err (!%p1498_p0)
}
 0x44f   : > { %s1502_s11 = scalar_lea.hbm %s1892_s25, 512  ;;  %s1506_s9 = scalar_lea.hbm %s1960_s6, 2048 }
 0x450   : > { %p1503_p1 = scmp.ne.s32.totalorder %s1892_s25, %s1502_s11  ;;  %p1507_p4 = scmp.lt.u32.totalorder %s1892_s25, %s1960_s6 }
 0x451   : > { %p1508_p5 = scmp.lt.u32.totalorder %s1506_s9, %s1502_s11  ;;  %p1510_p9 = scmp.lt.u32.totalorder %s1502_s11, %s1892_s25 }
 0x452   : > { %p1504_p2 = pnand %p1503_p1, %p1703_p6 }
 0x453   : > { %p1509_p8 = por %p1508_p5, %p1507_p4 }
 0x454   : > { %p1505_p3 = pneg %p1504_p2 }
 0x455   : > { %p1511_p10 = por %p1510_p9, %p1509_p8 }
 0x457   : > { %p1512_p11 = pnand %p1511_p10, %p1505_p3 }
 0x459   : > { %1515 = shalt.err (!%p1512_p11)
}
 0x45a   : > { %s1604_s24 = smov 128   ;;  %s1605_s27 = smov 8  }
 0x45b   : > { %1370 = dma.vmem_to_hbm [thread:$0]  (%p1703_p6), %s1887_s10, 512, %s1892_s25, %s1896_s17, %s1604_s24, %s1604_s24, %s1605_s27  }
 0x45c PF: > { %p1376_p12 = scmp.ge.s32.totalorder %s1598_s30, 2  ;;  %s1066_s18 = sand.u32 1, %s1562_s21  }
 0x45d   : > { %s1067_s19 = scalar_lea.sflag [#allocation7], %s1066_s18 }
 0x45e   : > { %p1373_p13 = pnand %p1376_p12, %p1710_p7 }
 0x460   : > { %1557 = dma.done.wait (!%p1373_p13), %s1067_s19, 512  }
 0x461   : > { %1559 = vsyncadd (!%p1373_p13), %s1067_s19, 4294966784  ;;  %s19_s30 = sadd.s32 1, %s1598_s30   ;;  %s1979_s16 = sld [smem:[#allocation9_spill]] }
 0x462   : > { %p16_p0 = scmp.ge.s32.totalorder %s19_s30, 18   ;;  %s1980_s23 = sld [smem:[#allocation16_spill]] }
 0x463   : > { %s1981_s24 = sld [smem:[#allocation10_spill]]  ;;  %s1982_s25 = sld [smem:[#allocation11_spill]] }
 0x464   : > { %s1983_s26 = sld [smem:[#allocation12_spill]]  ;;  %s1984_s27 = sld [smem:[#allocation13_spill]] }
 0x465   : > { %s1985_s28 = sld [smem:[#allocation14_spill]]  ;;  %s1986_s29 = sld [smem:[#allocation15_spill]] }
 0x466   : > { %s1987_s21 = smov %s1566_s22  ;;  %18 = sbr.rel (!%p16_p0) target bundleno = 6 (0x6), region = 109 }
 0x467   : > { %s1988_s22 = smov %s1979_s16 }
 0x46d   :  { %1072 = vsyncpa [#allocation7], 1 }
 0x46e   :  { %1074 = vsyncpa [#allocation7 + $0x1], 1 }

</bundles_post_ra>
